<compile_context>
chip_gen: v7x
topology: tpu7x:2x2x1
jax: 0.10.0
libtpu: 0.0.40
codegen_flags: <defaults>
</compile_context>

<pallas_src>
import jax
import jax.numpy as jnp
from jax.experimental import pallas as pl
from jax.experimental.pallas import tpu as pltpu

_LANE = 128
_T_HW_MAX = 32768                 # cap on spatial lanes per tile (8k-32k sweet spot)
_VMEM_BUDGET = 12 * 1024 * 1024   # double-buffered x+out budget; safe on v5e (16 MiB
                                  # default scoped VMEM) and v6e/v7x (32 MiB)


# ----------------------- concat branch: 1x1 Conv2d (NCHW) -----------------------

def _concat_kernel(x_ref, wct_ref, bc_ref, cc_ref):
    """One (batch, spatial-tile) step of the 1x1 conv.

    x_ref  : (1, C_in, t_hw)   channels on sublanes, spatial on lanes
    wct_ref: (C_out, C_in)     conv weight, transposed
    bc_ref : (C_out, 1)        conv bias (sublane broadcast)
    cc_ref : (1, C_out, t_hw)  output tile (already NCHW-flat)
    """
    acc = jnp.dot(wct_ref[...], x_ref[0], preferred_element_type=jnp.float32)
    cc_ref[0] = (acc + bc_ref[...]).astype(cc_ref.dtype)


def _pick_spatial_tile(hw, c_in, c_out, itemsize):
    """Pick the spatial tile from the VMEM budget (trace-time / static)."""
    per_lane = (c_in + c_out) * itemsize * 2          # in + out, double-buffered
    budget = max(_LANE, _VMEM_BUDGET // per_lane)
    budget = min(budget, _T_HW_MAX)
    if hw <= budget:
        return hw, hw                                  # one tile per batch, no pad
    # Prefer a 128-multiple divisor of HW: no wrapper-side pad / slice copies.
    t = (budget // _LANE) * _LANE
    while t >= _LANE:
        if hw % t == 0:
            return t, hw
        t -= _LANE
    # Rare fallback (HW not a multiple of 128): pad spatial axis, slice afterwards.
    t = (budget // _LANE) * _LANE
    return t, pl.cdiv(hw, t) * t


def _concat_call(x_flat, wct, bc, t_hw):
    B, C_in, HW_pad = x_flat.shape
    C_out = wct.shape[0]
    n_hw = HW_pad // t_hw

    if n_hw == 1:
        grid = (B,)
        x_map = lambda b: (b, 0, 0)
        const_map = lambda b: (0, 0)
        semantics = ("parallel",)
    else:
        grid = (B, n_hw)
        x_map = lambda b, j: (b, 0, j)
        const_map = lambda b, j: (0, 0)
        semantics = ("parallel", "parallel")   # both axes megacore-shardable

    return pl.pallas_call(
        _concat_kernel,
        out_shape=jax.ShapeDtypeStruct((B, C_out, HW_pad), x_flat.dtype),
        grid_spec=pltpu.PrefetchScalarGridSpec(
            num_scalar_prefetch=0,
            grid=grid,
            in_specs=[
                pl.BlockSpec((1, C_in, t_hw), x_map),
                pl.BlockSpec((C_out, C_in), const_map),
                pl.BlockSpec((C_out, 1), const_map),
            ],
            out_specs=pl.BlockSpec((1, C_out, t_hw), x_map),
        ),
        compiler_params=pltpu.CompilerParams(dimension_semantics=semantics),
    )(x_flat, wct, bc)


# ----------------------- crossattn branch: Linear on (B, S, D) ------------------

def _cross_kernel(c_ref, wx_ref, bx_ref, ca_ref):
    """Whole-array linear projection: (B*S, D_in) @ (D_in, D_out_pad) + bias."""
    acc = jnp.dot(c_ref[...], wx_ref[...], preferred_element_type=jnp.float32)
    ca_ref[...] = (acc + bx_ref[...]).astype(ca_ref.dtype)


def _cross_call(c2d, wx_pad, bx_pad):
    R, _ = c2d.shape
    D_out_pad = wx_pad.shape[1]
    # Microscopic: single step, whole arrays resident in VMEM.
    return pl.pallas_call(
        _cross_kernel,
        out_shape=jax.ShapeDtypeStruct((R, D_out_pad), c2d.dtype),
    )(c2d, wx_pad, bx_pad)


# --------------------------------- forward --------------------------------------

@jax.jit
def hybrid_conditioner_forward(c_concat, c_crossattn, params):
    """Forward of HybridConditioner.

    c_concat    : (B, C_in, H, W)   NCHW spatial conditioning
    c_crossattn : (B, S, D_in)      sequence conditioning
    params      : concat_w (C_in, C_out), concat_b (C_out,),
                  cross_w (D_in, D_out), cross_b (D_out,)
    """
    B, C_in, H, W = c_concat.shape
    Bc, S, D_in = c_crossattn.shape
    assert Bc == B, "both conditionings share the batch axis"
    C_out = params["concat_w"].shape[1]
    D_out = params["cross_w"].shape[1]

    # --- concat branch: NCHW viewed as (B, C_in, H*W); VMEM-budgeted tiling ---
    HW = H * W
    t_hw, hw_pad = _pick_spatial_tile(HW, C_in, C_out, c_concat.dtype.itemsize)
    x_flat = c_concat.reshape(B, C_in, HW)
    if hw_pad != HW:      # rare fallback; padded lanes hold bias, sliced off below
        x_flat = jnp.pad(x_flat, ((0, 0), (0, 0), (0, hw_pad - HW)))

    wct = params["concat_w"].T                   # (C_out, C_in)
    bc = params["concat_b"].reshape(C_out, 1)    # sublane broadcast

    cc_flat = _concat_call(x_flat, wct, bc, t_hw)
    if hw_pad != HW:
        cc_flat = cc_flat[:, :, :HW]
    cc = cc_flat.reshape(B, C_out, H, W)

    # --- crossattn branch: pad D_out to a lane multiple (unmasked stores) ---
    d_out_pad = pl.cdiv(D_out, _LANE) * _LANE
    wx = params["cross_w"]
    bx = params["cross_b"].reshape(1, D_out)
    if d_out_pad != D_out:
        wx = jnp.pad(wx, ((0, 0), (0, d_out_pad - D_out)))
        bx = jnp.pad(bx, ((0, 0), (0, d_out_pad - D_out)))

    ca_pad = _cross_call(c_crossattn.reshape(B * S, D_in), wx, bx)
    ca = ca_pad[:, :D_out].reshape(B, S, D_out)

    return {"c_concat": [cc], "c_crossattn": [ca]}


if __name__ == "__main__":
    key = jax.random.PRNGKey(0)
    k1, k2, k3, k4, k5, k6 = jax.random.split(key, 6)

    # Small shapes consistent with the module's forward.
    B, C_in, H, W = 2, 4, 16, 16
    C_out = 8
    S, D_in, D_out = 8, 32, 64

    c_concat = jax.random.normal(k1, (B, C_in, H, W), dtype=jnp.float32)
    c_crossattn = jax.random.normal(k2, (B, S, D_in), dtype=jnp.float32)

    # TODO(synk): sub-conditioners come from instantiate_from_config in the
    # original module; assumed here to be a 1x1 Conv2d and a Linear (hot paths).
    params = {
        "concat_w": 0.1 * jax.random.normal(k3, (C_in, C_out), dtype=jnp.float32),
        "concat_b": 0.01 * jax.random.normal(k4, (C_out,), dtype=jnp.float32),
        "cross_w": 0.1 * jax.random.normal(k5, (D_in, D_out), dtype=jnp.float32),
        "cross_b": 0.01 * jax.random.normal(k6, (D_out,), dtype=jnp.float32),
    }

    out = hybrid_conditioner_forward(c_concat, c_crossattn, params)
    jax.block_until_ready(out)

    # sanity check against a pure-JAX reference
    ref_cc = (
        jnp.einsum("bchw,cd->bdhw", c_concat, params["concat_w"])
        + params["concat_b"][None, :, None, None]
    )
    ref_ca = (
        jnp.einsum("bsd,de->bse", c_crossattn, params["cross_w"])
        + params["cross_b"]
    )
    assert out["c_concat"][0].shape == (B, C_out, H, W)
    assert out["c_crossattn"][0].shape == (B, S, D_out)
    assert jnp.allclose(out["c_concat"][0], ref_cc, atol=1e-5)
    assert jnp.allclose(out["c_crossattn"][0], ref_ca, atol=1e-5)

    print("KERNEL_OK")
</pallas_src>

<mosaic_0001>
module attributes {stable_mosaic.version = 11 : i64} {
  func.func @_cross_kernel(%arg0: memref<16x32xf32, #tpu.memory_space<vmem>>, %arg1: memref<32x128xf32, #tpu.memory_space<vmem>>, %arg2: memref<1x128xf32, #tpu.memory_space<vmem>>, %arg3: memref<16x128xf32, #tpu.memory_space<vmem>>) attributes {dimension_semantics = [], scalar_prefetch = 0 : i64, scratch_operands = 0 : i64, tpu.core_type = #tpu.core_type<tc>} {
    %c0 = arith.constant 0 : index
    %c0_0 = arith.constant 0 : index
    %0 = vector.load %arg0[%c0, %c0_0] : memref<16x32xf32, #tpu.memory_space<vmem>>, vector<16x32xf32>
    %c0_1 = arith.constant 0 : index
    %c0_2 = arith.constant 0 : index
    %1 = vector.load %arg1[%c0_1, %c0_2] : memref<32x128xf32, #tpu.memory_space<vmem>>, vector<32x128xf32>
    %cst = arith.constant dense<0.000000e+00> : vector<16x128xf32>
    %2 = tpu.matmul %0, %1, %cst {dimension_numbers = #tpu.dot_dimension_numbers<[1], [0], [0], [1], [0, 0, 1, 1], [], []>} : vector<16x32xf32>, vector<32x128xf32>, vector<16x128xf32> -> vector<16x128xf32>
    %c0_3 = arith.constant 0 : index
    %c0_4 = arith.constant 0 : index
    %3 = vector.load %arg2[%c0_3, %c0_4] : memref<1x128xf32, #tpu.memory_space<vmem>>, vector<1x128xf32>
    %4 = vector.broadcast %3 : vector<1x128xf32> to vector<16x128xf32>
    %5 = arith.addf %2, %4 : vector<16x128xf32>
    %c0_5 = arith.constant 0 : index
    %c0_6 = arith.constant 0 : index
    %6 = vector.load %arg3[%c0_5, %c0_6] : memref<16x128xf32, #tpu.memory_space<vmem>>, vector<16x128xf32>
    tpu.vector_store %arg3[%c0_5, %c0_6], %5 {strides = array<i32>} : memref<16x128xf32, #tpu.memory_space<vmem>>, vector<16x128xf32>,
    return
  }
}

module attributes {stable_mosaic.version = 11 : i64} {
  func.func @_concat_kernel(%arg0: i32, %arg1: memref<1x4x256xf32, #tpu.memory_space<vmem>>, %arg2: memref<8x4xf32, #tpu.memory_space<vmem>>, %arg3: memref<8x1xf32, #tpu.memory_space<vmem>>, %arg4: memref<1x8x256xf32, #tpu.memory_space<vmem>>) attributes {dimension_semantics = [#tpu.dimension_semantics<parallel>], iteration_bounds = array<i64: 2>, scalar_prefetch = 0 : i64, scratch_operands = 0 : i64, tpu.core_type = #tpu.core_type<tc>, window_params = [{transform_indices = @transform_0, window_bounds = array<i64: 1, 4, 256>}, {pipeline_mode = #tpu.pipeline_mode<synchronous>, transform_indices = @transform_1, window_bounds = array<i64: 8, 4>}, {pipeline_mode = #tpu.pipeline_mode<synchronous>, transform_indices = @transform_2, window_bounds = array<i64: 8, 1>}, {transform_indices = @transform_3, window_bounds = array<i64: 1, 8, 256>}]} {
    %c0 = arith.constant 0 : index
    %c0_0 = arith.constant 0 : index
    %0 = vector.load %arg2[%c0, %c0_0] : memref<8x4xf32, #tpu.memory_space<vmem>>, vector<8x4xf32>
    %c0_1 = arith.constant 0 : index
    %c0_2 = arith.constant 0 : index
    %c0_3 = arith.constant 0 : index
    %1 = vector.load %arg1[%c0_1, %c0_2, %c0_3] : memref<1x4x256xf32, #tpu.memory_space<vmem>>, vector<1x4x256xf32>
    %2 = vector.shape_cast %1 : vector<1x4x256xf32> to vector<4x256xf32>
    %cst = arith.constant dense<0.000000e+00> : vector<8x256xf32>
    %3 = tpu.matmul %0, %2, %cst {dimension_numbers = #tpu.dot_dimension_numbers<[1], [0], [0], [1], [0, 0, 1, 1], [], []>} : vector<8x4xf32>, vector<4x256xf32>, vector<8x256xf32> -> vector<8x256xf32>
    %c0_4 = arith.constant 0 : index
    %c0_5 = arith.constant 0 : index
    %4 = vector.load %arg3[%c0_4, %c0_5] : memref<8x1xf32, #tpu.memory_space<vmem>>, vector<8x1xf32>
    %5 = vector.broadcast %4 : vector<8x1xf32> to vector<8x256xf32>
    %6 = arith.addf %3, %5 : vector<8x256xf32>
    %c0_6 = arith.constant 0 : index
    %c0_7 = arith.constant 0 : index
    %c0_8 = arith.constant 0 : index
    %7 = vector.load %arg4[%c0_6, %c0_7, %c0_8] : memref<1x8x256xf32, #tpu.memory_space<vmem>>, vector<1x8x256xf32>
    %8 = vector.shape_cast %7 : vector<1x8x256xf32> to vector<8x256xf32>
    %9 = vector.shape_cast %6 : vector<8x256xf32> to vector<1x8x256xf32>
    tpu.vector_store %arg4[%c0_6, %c0_7, %c0_8], %9 {strides = array<i32>} : memref<1x8x256xf32, #tpu.memory_space<vmem>>, vector<1x8x256xf32>,
    return
  }
  func.func @transform_0(%arg0: i32) -> (i32, i32, i32) {
    %c0_i32 = arith.constant 0 : i32
    %c0_i32_0 = arith.constant 0 : i32
    %c0_i32_1 = arith.constant 0 : i32
    return %arg0, %c0_i32, %c0_i32_0 : i32, i32, i32
  }
  func.func @transform_1(%arg0: i32) -> (i32, i32) {
    %c0_i32 = arith.constant 0 : i32
    %c0_i32_0 = arith.constant 0 : i32
    %c0_i32_1 = arith.constant 0 : i32
    return %c0_i32, %c0_i32_0 : i32, i32
  }
  func.func @transform_2(%arg0: i32) -> (i32, i32) {
    %c0_i32 = arith.constant 0 : i32
    %c0_i32_0 = arith.constant 0 : i32
    %c0_i32_1 = arith.constant 0 : i32
    return %c0_i32, %c0_i32_0 : i32, i32
  }
  func.func @transform_3(%arg0: i32) -> (i32, i32, i32) {
    %c0_i32 = arith.constant 0 : i32
    %c0_i32_0 = arith.constant 0 : i32
    %c0_i32_1 = arith.constant 0 : i32
    return %arg0, %c0_i32, %c0_i32_0 : i32, i32, i32
  }
}

</mosaic_0001>

<bundles_post_ra>
// kernel: hybrid_conditioner_forward.3
= control target key start
LH: loop header
LB: loop body
LE: loop exit
PB: predicated region body
PF: predicated region fallthrough
CT: control target
= control target key end

     0   :  { %vm27_vm0 = vcmask 261120   ;;  %s190_s1 = inlined_call_operand.vmem [shape: f32[32,128], index: 1, kind: input, shape index: {}]   ;;  %s191_s0 = inlined_call_operand.vmem [shape: f32[16,32], index: 0, kind: input, shape index: {}]   ;;  %s192_s2 = inlined_call_operand.vmem [shape: f32[1,128], index: 2, kind: input, shape index: {}]   ;;  %s193_s3 = inlined_call_operand.vmem [shape: f32[16,128], index: 3, kind: output, shape index: {}]  }
   0x1   :  { %v16_v0 = vld [vmem:[%s190_s1] sm:$0xff]  ;;  %v17_v1 = vld [vmem:[%s190_s1 + $0x8] sm:$0xff]  ;;  %v18_v2 = vld [vmem:[%s190_s1 + $0x10] sm:$0xff] }
   0x2   :  { %v135_v3 = vpack.c.bf16 %v17_v1, %v16_v0  ;;  %v19_v4 = vld [vmem:[%s190_s1 + $0x18] sm:$0xff]  ;;  %v14_v5 = vld [vmem:[%s191_s0] sm:$0xff]  ;;  %v15_v7 = vld [vmem:[%s191_s0 + $0x8] sm:$0xff] }
   0x3   :  { %v139_v6 = vpack.c.bf16 %v19_v4, %v18_v2  ;;  %132 = vmatprep.mubr.msk.f32.mxu0 %vm27_vm0, %v14_v5  ;;  %v115_v8 = vld [vmem:[%s192_s2] ss:$0 sm:$0xff] }
   0x4   :  { %136 = vmatprep.subr.bf16.mxu0 %v135_v3 }
   0x5   :  { %138 = vmatpush3.bf16.msra.mxu0 %v135_v3 }
   0x6   :  { %140 = vmatprep.subr.bf16.mxu0 %v139_v6 }
   0x9   :  { %142 = vmatpush3.bf16.msra.mxu0 %v139_v6 }
   0xc   :  { %133 = vmatmul.mubr.msk.f32.vlgmr.msra.gmra.mrb[0].mxu0 %vm27_vm0, %v15_v7 }
  0xdf   :  { %v134_v9 = vpop.f32.mrb[0].mxu0 }
  0xe0   :  { %v106_v10 = vadd.f32 %v134_v9, %v115_v8  ;;  %v100_v11 = vpop.f32.mrb[1].mxu0 }
  0xe1   :  { %v101_v12 = vadd.f32 %v115_v8, %v100_v11 }
  0xe2   :  { %110 = vst [vmem:[%s193_s3 + $0x8] sm:$0xff] %v106_v10 }
  0xe3   :  { %109 = vst [vmem:[%s193_s3] sm:$0xff] %v101_v12 }

// kernel: hybrid_conditioner_forward.2
= control target key start
LH: loop header
LB: loop body
LE: loop exit
PB: predicated region body
PF: predicated region fallthrough
CT: control target
= control target key end

     0   :  { %s376_s12 = smov 0   ;;  %s399_s0 = inlined_call_operand.vmem [shape: f32[2,4,256], index: 0, kind: input, shape index: {}]   ;;  %s400_s1 = inlined_call_operand.vmem [shape: f32[8,4], index: 1, kind: input, shape index: {}]   ;;  %s401_s2 = inlined_call_operand.vmem [shape: f32[8,1], index: 2, kind: input, shape index: {}]   ;;  %s402_s3 = inlined_call_operand.vmem [shape: f32[2,8,256], index: 3, kind: output, shape index: {}]  }
   0x1 LB: > { %s318_s13 = sadd.s32 4294967295, %s352_s12   ;;  %p322_p0 = scmp.ge.s32.totalorder %s352_s12, 1  ;;  %s352_s12 = sphi %s376_s12, %s13_s12  }
   0x2   : > { %p137_p1 = scmp.lt.s32.totalorder %s352_s12, 3 }
   0x4   : > { %p138_p2 = pnand %p322_p0, %p137_p1 }
   0x5   : > { %p161_p3 = scmp.lt.s32.totalorder (!%p138_p2), %s318_s13, 1  ;;  %v354_v0 = vmov (!%p138_p2), 0.0   ;;  %v355_v1 = vmov (!%p138_p2), 0   ;;  %v173_v2 = vld [vmem:[%s401_s2] sm:$0xff] (!%p138_p2)  ;;  %vm185_vm0 = vcmask (!%p138_p2), 1043456   ;;  %vm181_vm1 = vcmask (!%p138_p2), 31744  }
   0x6   : > { %141 = sbr.rel (%p138_p2) target bundleno = 237 (0xed), region = 32  ;;  %254 = vmatprep.mubr.f32.mxu0 (!%p138_p2), %v354_v0  ;;  %344 = vset.pattern.permute.xlu0 (!%p138_p2), %v355_v1  ;;  %v171_v5 = vld [vmem:[%s400_s1] sm:$0xff] (!%p138_p2) }
   0x7   : > { %176 = vperm.xlu0 (!%p138_p2), %344, %v173_v2  }
   0xd   : > { %s404_s13 = smov (!%p161_p3, %s318_s13), 1 }
   0xe   : > { %s332_s16 = sshll.u32 %s404_s13, 3  ;;  %s333_s22 = sshll.u32 %s404_s13, 4 }
   0xf   : > { %s165_s19 = scalar_lea.vmem %s399_s0, %s332_s16  ;;  %s170_s25 = scalar_lea.vmem %s402_s3, %s333_s22 }
  0x10   : > { %v172_v3 = vld [vmem:[%s165_s19] sm:$0xff] }
  0x11   : > { %v180_v4 = vcombine.high %v172_v3, %v172_v3 }
  0x13   : > { %327 = vmatprep.subr.msk.mxu0 %vm185_vm0, %v180_v4 }
  0x14   : > { %328 = vmatpush1.msk.msra.mxu0 %vm185_vm0, %v172_v3 }
  0x15   : > { %329 = vmatmul.mubr.msk.f32.vlgmr.msra.gmra.mrb[0].mxu0 %vm181_vm1, %v171_v5 }
  0x86   : > { %v177_v6 = vpop.permute.xlu0 %176 }
  0xe8   : > { %v256_v7 = vpop.f32.mrb[0].mxu0 }
  0xe9   : > { %v257_v8 = vadd.f32 %v256_v7, %v177_v6  ;;  %v258_v9 = vpop.f32.mrb[1].mxu0 }
  0xea   : > { %v259_v10 = vadd.f32 %v258_v9, %v177_v6 }
  0xeb   : > { %261 = vst [vmem:[%s170_s25] sm:$0xff] %v257_v8 }
  0xec   : > { %262 = vst [vmem:[%s170_s25 + $0x8] sm:$0xff] %v259_v10 }
  0xed PF: > { %s13_s12 = sadd.s32 1, %s352_s12  }
  0xee   : > { %p10_p4 = scmp.ge.s32.totalorder %s13_s12, 4  }
  0xf0   :  { %12 = sbr.rel (!%p10_p4) target bundleno = 1 (0x1), region = 62 }

</bundles_post_ra>
